<compile_context>
chip_gen: v6e
topology: v6e:2x2x1
jax: 0.10.0
libtpu: 0.0.40
codegen_flags: <defaults>
</compile_context>

<pallas_src>
import functools

import jax
import jax.numpy as jnp
from jax import lax
from jax.experimental import pallas as pl
from jax.experimental.pallas import tpu as pltpu


# --------------------------------------------------------------------------- #
# Kernel
# --------------------------------------------------------------------------- #
def _fused_conv_block_kernel(x_ref, m_ref, w1_ref, b1_ref, w2_ref, b2_ref,
                             o_ref, *, H, W):
    """Fused (conv3x3 pad=1 + folded-BN + ReLU) x 2 for one image, all in VMEM.

    x_ref:  (1, Cin, H*W)    flattened channels-first input (lane-dense)
    m_ref:  (9, H*W)         per-tap validity masks (1.0 = in-image, 0.0 = padding)
    w1_ref: (Cmid, 9*Cin)    conv1 weights, BN1 scale folded in, K ordered (kh, kw, cin)
    b1_ref: (Cmid, 1)        folded conv1 + BN1 bias
    w2_ref: (Cout, 9*Cmid)   conv2 weights, BN2 scale folded in
    b2_ref: (Cout, 1)        folded conv2 + BN2 bias
    o_ref:  (1, Cout, H*W)   lane-dense output slab (reshaped to NCHW outside)
    """
    HW = H * W
    cdt = x_ref.dtype

    def im2col(x2d):
        # x2d: (C, HW) -> (9*C, HW) im2col slab, K ordered (kh, kw, cin).
        # For output flat index i = h*W + w, tap (kh, kw) reads the input at flat
        # index i + off with off = (kh-1)*W + (kw-1); lane-shift by -off and kill
        # out-of-image (padding) positions with the precomputed 0/1 mask.
        pieces = []
        t = 0
        for kh in range(3):
            for kw in range(3):
                off = (kh - 1) * W + (kw - 1)
                # shifted[:, i] = x2d[:, i + off]  (mod HW; any wrap is zeroed by mask)
                shifted = jnp.roll(x2d, shift=-off, axis=1) if off else x2d
                mask = m_ref[pl.ds(t, 1), :]          # (1, HW), same dtype as x2d
                pieces.append(shifted * mask)
                t += 1
        return jnp.concatenate(pieces, axis=0)         # (9*C, HW)

    # ---- layer 1: conv3x3 (BN1 scale pre-folded into w1) + bias + ReLU --------
    cols1 = im2col(x_ref[0])                                           # (9*Cin, HW)
    y1 = jnp.dot(w1_ref[...], cols1, preferred_element_type=jnp.float32)
    y1 = jnp.maximum(y1 + b1_ref[...], 0.0)                            # (Cmid, HW) f32

    # ---- layer 2: conv3x3 + bias + ReLU; intermediate never leaves VMEM -------
    cols2 = im2col(y1.astype(cdt))                                     # (9*Cmid, HW)
    y2 = jnp.dot(w2_ref[...], cols2, preferred_element_type=jnp.float32)
    y2 = jnp.maximum(y2 + b2_ref[...], 0.0)                            # (Cout, HW) f32

    # Lane-dense store: last dim = H*W (256 here, a multiple of 128).
    o_ref[0] = y2.astype(o_ref.dtype)


# --------------------------------------------------------------------------- #
# Wrapper
# --------------------------------------------------------------------------- #
def _tap_masks(H, W):
    """(9, H*W) validity mask per 3x3 tap for padding=1 (1.0 in-image, 0.0 pad)."""
    hh = jnp.arange(H)[:, None]
    ww = jnp.arange(W)[None, :]
    rows = []
    for kh in range(3):
        for kw in range(3):
            dh, dw = kh - 1, kw - 1
            m = ((hh + dh >= 0) & (hh + dh < H) &
                 (ww + dw >= 0) & (ww + dw < W))
            rows.append(m.reshape(-1))
    return jnp.stack(rows, axis=0).astype(jnp.float32)


def conv_block_fused(x_nchw, w1_mat, b1, w2_mat, b2, *,
                     compute_dtype=jnp.float32):
    """x_nchw: (N, Cin, H, W); w*_mat: (Cout_l, 9*Cin_l); b*: (Cout_l,)."""
    N, Cin, H, W = x_nchw.shape
    Cmid = w1_mat.shape[0]
    Cout = w2_mat.shape[0]
    HW = H * W

    # Free, contiguous metadata reshape to the lane-dense 2-D-per-image layout.
    x = x_nchw.reshape(N, Cin, HW).astype(compute_dtype)
    w1 = w1_mat.astype(compute_dtype)
    w2 = w2_mat.astype(compute_dtype)
    b1c = b1.reshape(Cmid, 1).astype(jnp.float32)
    b2c = b2.reshape(Cout, 1).astype(jnp.float32)
    masks = _tap_masks(H, W).astype(compute_dtype)       # (9, HW), constant

    kernel = functools.partial(_fused_conv_block_kernel, H=H, W=W)

    grid_spec = pltpu.PrefetchScalarGridSpec(
        num_scalar_prefetch=0,
        grid=(N,),
        in_specs=[
            pl.BlockSpec((1, Cin, HW), lambda n: (n, 0, 0)),
            pl.BlockSpec((9, HW), lambda n: (0, 0)),
            pl.BlockSpec((Cmid, 9 * Cin), lambda n: (0, 0)),
            pl.BlockSpec((Cmid, 1), lambda n: (0, 0)),
            pl.BlockSpec((Cout, 9 * Cmid), lambda n: (0, 0)),
            pl.BlockSpec((Cout, 1), lambda n: (0, 0)),
        ],
        out_specs=pl.BlockSpec((1, Cout, HW), lambda n: (n, 0, 0)),
    )

    out = pl.pallas_call(
        kernel,
        out_shape=jax.ShapeDtypeStruct((N, Cout, HW), jnp.float32),
        grid_spec=grid_spec,
        compiler_params=pltpu.CompilerParams(
            dimension_semantics=("parallel",)),
    )(x, masks, w1, b1c, w2, b2c)

    # (N, Cout, H*W) -> (N, Cout, H, W): already channels-first, free reshape.
    return out.reshape(N, Cout, H, W)


def _fold_bn(conv_bias, gamma, beta, running_mean, running_var, eps=1e-5):
    """Fold conv bias + inference BatchNorm into per-channel (scale, bias)."""
    scale = gamma / jnp.sqrt(running_var + eps)
    bias = (conv_bias - running_mean) * scale + beta
    return scale, bias


def _conv_weight_matrix(w_oihw, scale):
    """OIHW [Cout, Cin, 3, 3] -> [Cout, 9*Cin] with K ordered (kh, kw, cin),
    with the BN scale folded into the output-channel rows."""
    cout, cin = w_oihw.shape[0], w_oihw.shape[1]
    w = jnp.transpose(w_oihw, (0, 2, 3, 1)).reshape(cout, 9 * cin)
    return w * scale[:, None]


def init_conv_block_params(key, in_c, out_c):
    """Deterministic synthetic parameters matching conv_block's shapes."""
    ks = jax.random.split(key, 6)
    fan1 = in_c * 9
    fan2 = out_c * 9
    return {
        # PyTorch OIHW conv weights + biases
        "w1": jax.random.uniform(ks[0], (out_c, in_c, 3, 3), jnp.float32,
                                 -1.0 / jnp.sqrt(fan1), 1.0 / jnp.sqrt(fan1)),
        "b1": jax.random.uniform(ks[1], (out_c,), jnp.float32,
                                 -1.0 / jnp.sqrt(fan1), 1.0 / jnp.sqrt(fan1)),
        "w2": jax.random.uniform(ks[2], (out_c, out_c, 3, 3), jnp.float32,
                                 -1.0 / jnp.sqrt(fan2), 1.0 / jnp.sqrt(fan2)),
        "b2": jax.random.uniform(ks[3], (out_c,), jnp.float32,
                                 -1.0 / jnp.sqrt(fan2), 1.0 / jnp.sqrt(fan2)),
        # BatchNorm params / running stats (perturbed so the affine is non-trivial)
        "bn1_gamma": 1.0 + 0.1 * jax.random.normal(ks[4], (out_c,), jnp.float32),
        "bn1_beta": jnp.zeros((out_c,), jnp.float32) + 0.05,
        "bn1_mean": jnp.zeros((out_c,), jnp.float32),
        "bn1_var": jnp.ones((out_c,), jnp.float32),
        "bn2_gamma": 1.0 + 0.1 * jax.random.normal(ks[5], (out_c,), jnp.float32),
        "bn2_beta": jnp.zeros((out_c,), jnp.float32) - 0.05,
        "bn2_mean": jnp.zeros((out_c,), jnp.float32),
        "bn2_var": jnp.ones((out_c,), jnp.float32),
    }


@functools.partial(jax.jit, static_argnames=("compute_dtype",))
def conv_block_forward(x_nchw, params, compute_dtype=jnp.float32):
    """Forward pass of conv_block. Input/output in NCHW to match PyTorch.
    compute_dtype=jnp.bfloat16 halves HBM/VMEM traffic (f32 MXU accumulation)."""
    s1, bf1 = _fold_bn(params["b1"], params["bn1_gamma"], params["bn1_beta"],
                       params["bn1_mean"], params["bn1_var"])
    s2, bf2 = _fold_bn(params["b2"], params["bn2_gamma"], params["bn2_beta"],
                       params["bn2_mean"], params["bn2_var"])
    w1 = _conv_weight_matrix(params["w1"], s1)
    w2 = _conv_weight_matrix(params["w2"], s2)
    return conv_block_fused(x_nchw, w1, bf1, w2, bf2,
                            compute_dtype=compute_dtype)


# --------------------------------------------------------------------------- #
# Pure-JAX reference (for correctness checking)
# --------------------------------------------------------------------------- #
def _reference_forward(x_nchw, params):
    x = jnp.transpose(x_nchw, (0, 2, 3, 1))
    dn = lax.conv_dimension_numbers(x.shape, (3, 3, 1, 1),
                                    ("NHWC", "HWIO", "NHWC"))

    def block(x, w_oihw, b, g, beta, mean, var):
        w_hwio = jnp.transpose(w_oihw, (2, 3, 1, 0))
        y = lax.conv_general_dilated(x, w_hwio, (1, 1), "SAME",
                                     dimension_numbers=dn,
                                     precision=lax.Precision.HIGHEST) + b
        y = (y - mean) / jnp.sqrt(var + 1e-5) * g + beta
        return jnp.maximum(y, 0.0)

    x = block(x, params["w1"], params["b1"], params["bn1_gamma"],
              params["bn1_beta"], params["bn1_mean"], params["bn1_var"])
    x = block(x, params["w2"], params["b2"], params["bn2_gamma"],
              params["bn2_beta"], params["bn2_mean"], params["bn2_var"])
    return jnp.transpose(x, (0, 3, 1, 2))


if __name__ == "__main__":
    key = jax.random.PRNGKey(0)
    k_x, k_p = jax.random.split(key)

    N, IN_C, OUT_C, H, W = 2, 4, 8, 16, 16
    x = jax.random.normal(k_x, (N, IN_C, H, W), jnp.float32)   # NCHW, like PyTorch
    params = init_conv_block_params(k_p, IN_C, OUT_C)

    out = jax.block_until_ready(conv_block_forward(x, params))
    ref = jax.block_until_ready(_reference_forward(x, params))

    assert out.shape == (N, OUT_C, H, W)
    max_err = float(jnp.max(jnp.abs(out - ref)))
    # Tolerance covers MXU default-precision f32 matmuls; real bugs (wrong tap /
    # shift / mask / BN fold) produce O(0.1..1) errors and would trip this.
    assert jnp.allclose(out, ref, atol=2e-2, rtol=2e-2), \
        f"mismatch vs reference, max abs err = {max_err}"

    print("KERNEL_OK")
</pallas_src>

<mosaic_0001>
module attributes {stable_mosaic.version = 11 : i64} {
  func.func @_fused_conv_block_kernel(%arg0: i32, %arg1: memref<1x4x256xf32, #tpu.memory_space<vmem>>, %arg2: memref<9x256xf32, #tpu.memory_space<vmem>>, %arg3: memref<8x36xf32, #tpu.memory_space<vmem>>, %arg4: memref<8x1xf32, #tpu.memory_space<vmem>>, %arg5: memref<8x72xf32, #tpu.memory_space<vmem>>, %arg6: memref<8x1xf32, #tpu.memory_space<vmem>>, %arg7: memref<1x8x256xf32, #tpu.memory_space<vmem>>) attributes {dimension_semantics = [#tpu.dimension_semantics<parallel>], iteration_bounds = array<i64: 2>, scalar_prefetch = 0 : i64, scratch_operands = 0 : i64, tpu.core_type = #tpu.core_type<tc>, window_params = [{transform_indices = @transform_0, window_bounds = array<i64: 1, 4, 256>}, {pipeline_mode = #tpu.pipeline_mode<synchronous>, transform_indices = @transform_1, window_bounds = array<i64: 9, 256>}, {pipeline_mode = #tpu.pipeline_mode<synchronous>, transform_indices = @transform_2, window_bounds = array<i64: 8, 36>}, {pipeline_mode = #tpu.pipeline_mode<synchronous>, transform_indices = @transform_3, window_bounds = array<i64: 8, 1>}, {pipeline_mode = #tpu.pipeline_mode<synchronous>, transform_indices = @transform_4, window_bounds = array<i64: 8, 72>}, {pipeline_mode = #tpu.pipeline_mode<synchronous>, transform_indices = @transform_5, window_bounds = array<i64: 8, 1>}, {transform_indices = @transform_6, window_bounds = array<i64: 1, 8, 256>}]} {
    %c0 = arith.constant 0 : index
    %c0_0 = arith.constant 0 : index
    %c0_1 = arith.constant 0 : index
    %0 = vector.load %arg1[%c0, %c0_0, %c0_1] : memref<1x4x256xf32, #tpu.memory_space<vmem>>, vector<1x4x256xf32>
    %1 = vector.shape_cast %0 : vector<1x4x256xf32> to vector<4x256xf32>
    %2 = vector.extract_strided_slice %1 {offsets = [0, 239], sizes = [4, 17], strides = [1, 1]} : vector<4x256xf32> to vector<4x17xf32>
    %3 = vector.extract_strided_slice %1 {offsets = [0, 0], sizes = [4, 239], strides = [1, 1]} : vector<4x256xf32> to vector<4x239xf32>
    %4 = tpu.concatenate %2, %3 in 1 : vector<4x17xf32>, vector<4x239xf32> -> vector<4x256xf32>
    %c0_2 = arith.constant 0 : index
    %c0_3 = arith.constant 0 : index
    %5 = vector.load %arg2[%c0_2, %c0_3] : memref<9x256xf32, #tpu.memory_space<vmem>>, vector<1x256xf32>
    %6 = vector.broadcast %5 : vector<1x256xf32> to vector<4x256xf32>
    %7 = arith.mulf %4, %6 : vector<4x256xf32>
    %8 = vector.extract_strided_slice %1 {offsets = [0, 240], sizes = [4, 16], strides = [1, 1]} : vector<4x256xf32> to vector<4x16xf32>
    %9 = vector.extract_strided_slice %1 {offsets = [0, 0], sizes = [4, 240], strides = [1, 1]} : vector<4x256xf32> to vector<4x240xf32>
    %10 = tpu.concatenate %8, %9 in 1 : vector<4x16xf32>, vector<4x240xf32> -> vector<4x256xf32>
    %c1 = arith.constant 1 : index
    %c0_4 = arith.constant 0 : index
    %11 = vector.load %arg2[%c1, %c0_4] : memref<9x256xf32, #tpu.memory_space<vmem>>, vector<1x256xf32>
    %12 = vector.broadcast %11 : vector<1x256xf32> to vector<4x256xf32>
    %13 = arith.mulf %10, %12 : vector<4x256xf32>
    %14 = vector.extract_strided_slice %1 {offsets = [0, 241], sizes = [4, 15], strides = [1, 1]} : vector<4x256xf32> to vector<4x15xf32>
    %15 = vector.extract_strided_slice %1 {offsets = [0, 0], sizes = [4, 241], strides = [1, 1]} : vector<4x256xf32> to vector<4x241xf32>
    %16 = tpu.concatenate %14, %15 in 1 : vector<4x15xf32>, vector<4x241xf32> -> vector<4x256xf32>
    %c2 = arith.constant 2 : index
    %c0_5 = arith.constant 0 : index
    %17 = vector.load %arg2[%c2, %c0_5] : memref<9x256xf32, #tpu.memory_space<vmem>>, vector<1x256xf32>
    %18 = vector.broadcast %17 : vector<1x256xf32> to vector<4x256xf32>
    %19 = arith.mulf %16, %18 : vector<4x256xf32>
    %20 = vector.extract_strided_slice %1 {offsets = [0, 255], sizes = [4, 1], strides = [1, 1]} : vector<4x256xf32> to vector<4x1xf32>
    %21 = vector.extract_strided_slice %1 {offsets = [0, 0], sizes = [4, 255], strides = [1, 1]} : vector<4x256xf32> to vector<4x255xf32>
    %22 = tpu.concatenate %20, %21 in 1 : vector<4x1xf32>, vector<4x255xf32> -> vector<4x256xf32>
    %c3 = arith.constant 3 : index
    %c0_6 = arith.constant 0 : index
    %23 = vector.load %arg2[%c3, %c0_6] : memref<9x256xf32, #tpu.memory_space<vmem>>, vector<1x256xf32>
    %24 = vector.broadcast %23 : vector<1x256xf32> to vector<4x256xf32>
    %25 = arith.mulf %22, %24 : vector<4x256xf32>
    %c4 = arith.constant 4 : index
    %c0_7 = arith.constant 0 : index
    %26 = vector.load %arg2[%c4, %c0_7] : memref<9x256xf32, #tpu.memory_space<vmem>>, vector<1x256xf32>
    %27 = vector.broadcast %26 : vector<1x256xf32> to vector<4x256xf32>
    %28 = arith.mulf %1, %27 : vector<4x256xf32>
    %29 = vector.extract_strided_slice %1 {offsets = [0, 1], sizes = [4, 255], strides = [1, 1]} : vector<4x256xf32> to vector<4x255xf32>
    %30 = vector.extract_strided_slice %1 {offsets = [0, 0], sizes = [4, 1], strides = [1, 1]} : vector<4x256xf32> to vector<4x1xf32>
    %31 = tpu.concatenate %29, %30 in 1 : vector<4x255xf32>, vector<4x1xf32> -> vector<4x256xf32>
    %c5 = arith.constant 5 : index
    %c0_8 = arith.constant 0 : index
    %32 = vector.load %arg2[%c5, %c0_8] : memref<9x256xf32, #tpu.memory_space<vmem>>, vector<1x256xf32>
    %33 = vector.broadcast %32 : vector<1x256xf32> to vector<4x256xf32>
    %34 = arith.mulf %31, %33 : vector<4x256xf32>
    %35 = vector.extract_strided_slice %1 {offsets = [0, 15], sizes = [4, 241], strides = [1, 1]} : vector<4x256xf32> to vector<4x241xf32>
    %36 = vector.extract_strided_slice %1 {offsets = [0, 0], sizes = [4, 15], strides = [1, 1]} : vector<4x256xf32> to vector<4x15xf32>
    %37 = tpu.concatenate %35, %36 in 1 : vector<4x241xf32>, vector<4x15xf32> -> vector<4x256xf32>
    %c6 = arith.constant 6 : index
    %c0_9 = arith.constant 0 : index
    %38 = vector.load %arg2[%c6, %c0_9] : memref<9x256xf32, #tpu.memory_space<vmem>>, vector<1x256xf32>
    %39 = vector.broadcast %38 : vector<1x256xf32> to vector<4x256xf32>
    %40 = arith.mulf %37, %39 : vector<4x256xf32>
    %41 = vector.extract_strided_slice %1 {offsets = [0, 16], sizes = [4, 240], strides = [1, 1]} : vector<4x256xf32> to vector<4x240xf32>
    %42 = vector.extract_strided_slice %1 {offsets = [0, 0], sizes = [4, 16], strides = [1, 1]} : vector<4x256xf32> to vector<4x16xf32>
    %43 = tpu.concatenate %41, %42 in 1 : vector<4x240xf32>, vector<4x16xf32> -> vector<4x256xf32>
    %c7 = arith.constant 7 : index
    %c0_10 = arith.constant 0 : index
    %44 = vector.load %arg2[%c7, %c0_10] : memref<9x256xf32, #tpu.memory_space<vmem>>, vector<1x256xf32>
    %45 = vector.broadcast %44 : vector<1x256xf32> to vector<4x256xf32>
    %46 = arith.mulf %43, %45 : vector<4x256xf32>
    %47 = vector.extract_strided_slice %1 {offsets = [0, 17], sizes = [4, 239], strides = [1, 1]} : vector<4x256xf32> to vector<4x239xf32>
    %48 = vector.extract_strided_slice %1 {offsets = [0, 0], sizes = [4, 17], strides = [1, 1]} : vector<4x256xf32> to vector<4x17xf32>
    %49 = tpu.concatenate %47, %48 in 1 : vector<4x239xf32>, vector<4x17xf32> -> vector<4x256xf32>
    %c8 = arith.constant 8 : index
    %c0_11 = arith.constant 0 : index
    %50 = vector.load %arg2[%c8, %c0_11] : memref<9x256xf32, #tpu.memory_space<vmem>>, vector<1x256xf32>
    %51 = vector.broadcast %50 : vector<1x256xf32> to vector<4x256xf32>
    %52 = arith.mulf %49, %51 : vector<4x256xf32>
    %53 = tpu.concatenate %7, %13, %19, %25, %28, %34, %40, %46, %52 in 0 : vector<4x256xf32>, vector<4x256xf32>, vector<4x256xf32>, vector<4x256xf32>, vector<4x256xf32>, vector<4x256xf32>, vector<4x256xf32>, vector<4x256xf32>, vector<4x256xf32> -> vector<36x256xf32>
    %c0_12 = arith.constant 0 : index
    %c0_13 = arith.constant 0 : index
    %54 = vector.load %arg3[%c0_12, %c0_13] : memref<8x36xf32, #tpu.memory_space<vmem>>, vector<8x36xf32>
    %cst = arith.constant dense<0.000000e+00> : vector<8x256xf32>
    %55 = tpu.matmul %54, %53, %cst {dimension_numbers = #tpu.dot_dimension_numbers<[1], [0], [0], [1], [0, 0, 1, 1], [], []>} : vector<8x36xf32>, vector<36x256xf32>, vector<8x256xf32> -> vector<8x256xf32>
    %c0_14 = arith.constant 0 : index
    %c0_15 = arith.constant 0 : index
    %56 = vector.load %arg4[%c0_14, %c0_15] : memref<8x1xf32, #tpu.memory_space<vmem>>, vector<8x1xf32>
    %57 = vector.broadcast %56 : vector<8x1xf32> to vector<8x256xf32>
    %58 = arith.addf %55, %57 : vector<8x256xf32>
    %cst_16 = arith.constant 0.000000e+00 : f32
    %59 = vector.broadcast %cst_16 : f32 to vector<8x256xf32>
    %60 = arith.maximumf %58, %59 : vector<8x256xf32>
    %61 = vector.extract_strided_slice %60 {offsets = [0, 239], sizes = [8, 17], strides = [1, 1]} : vector<8x256xf32> to vector<8x17xf32>
    %62 = vector.extract_strided_slice %60 {offsets = [0, 0], sizes = [8, 239], strides = [1, 1]} : vector<8x256xf32> to vector<8x239xf32>
    %63 = tpu.concatenate %61, %62 in 1 : vector<8x17xf32>, vector<8x239xf32> -> vector<8x256xf32>
    %c0_17 = arith.constant 0 : index
    %c0_18 = arith.constant 0 : index
    %64 = vector.load %arg2[%c0_17, %c0_18] : memref<9x256xf32, #tpu.memory_space<vmem>>, vector<1x256xf32>
    %65 = vector.broadcast %64 : vector<1x256xf32> to vector<8x256xf32>
    %66 = arith.mulf %63, %65 : vector<8x256xf32>
    %67 = vector.extract_strided_slice %60 {offsets = [0, 240], sizes = [8, 16], strides = [1, 1]} : vector<8x256xf32> to vector<8x16xf32>
    %68 = vector.extract_strided_slice %60 {offsets = [0, 0], sizes = [8, 240], strides = [1, 1]} : vector<8x256xf32> to vector<8x240xf32>
    %69 = tpu.concatenate %67, %68 in 1 : vector<8x16xf32>, vector<8x240xf32> -> vector<8x256xf32>
    %c1_19 = arith.constant 1 : index
    %c0_20 = arith.constant 0 : index
    %70 = vector.load %arg2[%c1_19, %c0_20] : memref<9x256xf32, #tpu.memory_space<vmem>>, vector<1x256xf32>
    %71 = vector.broadcast %70 : vector<1x256xf32> to vector<8x256xf32>
    %72 = arith.mulf %69, %71 : vector<8x256xf32>
    %73 = vector.extract_strided_slice %60 {offsets = [0, 241], sizes = [8, 15], strides = [1, 1]} : vector<8x256xf32> to vector<8x15xf32>
    %74 = vector.extract_strided_slice %60 {offsets = [0, 0], sizes = [8, 241], strides = [1, 1]} : vector<8x256xf32> to vector<8x241xf32>
    %75 = tpu.concatenate %73, %74 in 1 : vector<8x15xf32>, vector<8x241xf32> -> vector<8x256xf32>
    %c2_21 = arith.constant 2 : index
    %c0_22 = arith.constant 0 : index
    %76 = vector.load %arg2[%c2_21, %c0_22] : memref<9x256xf32, #tpu.memory_space<vmem>>, vector<1x256xf32>
    %77 = vector.broadcast %76 : vector<1x256xf32> to vector<8x256xf32>
    %78 = arith.mulf %75, %77 : vector<8x256xf32>
    %79 = vector.extract_strided_slice %60 {offsets = [0, 255], sizes = [8, 1], strides = [1, 1]} : vector<8x256xf32> to vector<8x1xf32>
    %80 = vector.extract_strided_slice %60 {offsets = [0, 0], sizes = [8, 255], strides = [1, 1]} : vector<8x256xf32> to vector<8x255xf32>
    %81 = tpu.concatenate %79, %80 in 1 : vector<8x1xf32>, vector<8x255xf32> -> vector<8x256xf32>
    %c3_23 = arith.constant 3 : index
    %c0_24 = arith.constant 0 : index
    %82 = vector.load %arg2[%c3_23, %c0_24] : memref<9x256xf32, #tpu.memory_space<vmem>>, vector<1x256xf32>
    %83 = vector.broadcast %82 : vector<1x256xf32> to vector<8x256xf32>
    %84 = arith.mulf %81, %83 : vector<8x256xf32>
    %c4_25 = arith.constant 4 : index
    %c0_26 = arith.constant 0 : index
    %85 = vector.load %arg2[%c4_25, %c0_26] : memref<9x256xf32, #tpu.memory_space<vmem>>, vector<1x256xf32>
    %86 = vector.broadcast %85 : vector<1x256xf32> to vector<8x256xf32>
    %87 = arith.mulf %60, %86 : vector<8x256xf32>
    %88 = vector.extract_strided_slice %60 {offsets = [0, 1], sizes = [8, 255], strides = [1, 1]} : vector<8x256xf32> to vector<8x255xf32>
    %89 = vector.extract_strided_slice %60 {offsets = [0, 0], sizes = [8, 1], strides = [1, 1]} : vector<8x256xf32> to vector<8x1xf32>
    %90 = tpu.concatenate %88, %89 in 1 : vector<8x255xf32>, vector<8x1xf32> -> vector<8x256xf32>
    %c5_27 = arith.constant 5 : index
    %c0_28 = arith.constant 0 : index
    %91 = vector.load %arg2[%c5_27, %c0_28] : memref<9x256xf32, #tpu.memory_space<vmem>>, vector<1x256xf32>
    %92 = vector.broadcast %91 : vector<1x256xf32> to vector<8x256xf32>
    %93 = arith.mulf %90, %92 : vector<8x256xf32>
    %94 = vector.extract_strided_slice %60 {offsets = [0, 15], sizes = [8, 241], strides = [1, 1]} : vector<8x256xf32> to vector<8x241xf32>
    %95 = vector.extract_strided_slice %60 {offsets = [0, 0], sizes = [8, 15], strides = [1, 1]} : vector<8x256xf32> to vector<8x15xf32>
    %96 = tpu.concatenate %94, %95 in 1 : vector<8x241xf32>, vector<8x15xf32> -> vector<8x256xf32>
    %c6_29 = arith.constant 6 : index
    %c0_30 = arith.constant 0 : index
    %97 = vector.load %arg2[%c6_29, %c0_30] : memref<9x256xf32, #tpu.memory_space<vmem>>, vector<1x256xf32>
    %98 = vector.broadcast %97 : vector<1x256xf32> to vector<8x256xf32>
    %99 = arith.mulf %96, %98 : vector<8x256xf32>
    %100 = vector.extract_strided_slice %60 {offsets = [0, 16], sizes = [8, 240], strides = [1, 1]} : vector<8x256xf32> to vector<8x240xf32>
    %101 = vector.extract_strided_slice %60 {offsets = [0, 0], sizes = [8, 16], strides = [1, 1]} : vector<8x256xf32> to vector<8x16xf32>
    %102 = tpu.concatenate %100, %101 in 1 : vector<8x240xf32>, vector<8x16xf32> -> vector<8x256xf32>
    %c7_31 = arith.constant 7 : index
    %c0_32 = arith.constant 0 : index
    %103 = vector.load %arg2[%c7_31, %c0_32] : memref<9x256xf32, #tpu.memory_space<vmem>>, vector<1x256xf32>
    %104 = vector.broadcast %103 : vector<1x256xf32> to vector<8x256xf32>
    %105 = arith.mulf %102, %104 : vector<8x256xf32>
    %106 = vector.extract_strided_slice %60 {offsets = [0, 17], sizes = [8, 239], strides = [1, 1]} : vector<8x256xf32> to vector<8x239xf32>
    %107 = vector.extract_strided_slice %60 {offsets = [0, 0], sizes = [8, 17], strides = [1, 1]} : vector<8x256xf32> to vector<8x17xf32>
    %108 = tpu.concatenate %106, %107 in 1 : vector<8x239xf32>, vector<8x17xf32> -> vector<8x256xf32>
    %c8_33 = arith.constant 8 : index
    %c0_34 = arith.constant 0 : index
    %109 = vector.load %arg2[%c8_33, %c0_34] : memref<9x256xf32, #tpu.memory_space<vmem>>, vector<1x256xf32>
    %110 = vector.broadcast %109 : vector<1x256xf32> to vector<8x256xf32>
    %111 = arith.mulf %108, %110 : vector<8x256xf32>
    %112 = tpu.concatenate %66, %72, %78, %84, %87, %93, %99, %105, %111 in 0 : vector<8x256xf32>, vector<8x256xf32>, vector<8x256xf32>, vector<8x256xf32>, vector<8x256xf32>, vector<8x256xf32>, vector<8x256xf32>, vector<8x256xf32>, vector<8x256xf32> -> vector<72x256xf32>
    %c0_35 = arith.constant 0 : index
    %c0_36 = arith.constant 0 : index
    %113 = vector.load %arg5[%c0_35, %c0_36] : memref<8x72xf32, #tpu.memory_space<vmem>>, vector<8x72xf32>
    %cst_37 = arith.constant dense<0.000000e+00> : vector<8x256xf32>
    %114 = tpu.matmul %113, %112, %cst_37 {dimension_numbers = #tpu.dot_dimension_numbers<[1], [0], [0], [1], [0, 0, 1, 1], [], []>} : vector<8x72xf32>, vector<72x256xf32>, vector<8x256xf32> -> vector<8x256xf32>
    %c0_38 = arith.constant 0 : index
    %c0_39 = arith.constant 0 : index
    %115 = vector.load %arg6[%c0_38, %c0_39] : memref<8x1xf32, #tpu.memory_space<vmem>>, vector<8x1xf32>
    %116 = vector.broadcast %115 : vector<8x1xf32> to vector<8x256xf32>
    %117 = arith.addf %114, %116 : vector<8x256xf32>
    %cst_40 = arith.constant 0.000000e+00 : f32
    %118 = vector.broadcast %cst_40 : f32 to vector<8x256xf32>
    %119 = arith.maximumf %117, %118 : vector<8x256xf32>
    %c0_41 = arith.constant 0 : index
    %c0_42 = arith.constant 0 : index
    %c0_43 = arith.constant 0 : index
    %120 = vector.load %arg7[%c0_41, %c0_42, %c0_43] : memref<1x8x256xf32, #tpu.memory_space<vmem>>, vector<1x8x256xf32>
    %121 = vector.shape_cast %120 : vector<1x8x256xf32> to vector<8x256xf32>
    %122 = vector.shape_cast %119 : vector<8x256xf32> to vector<1x8x256xf32>
    tpu.vector_store %arg7[%c0_41, %c0_42, %c0_43], %122 {strides = array<i32>} : memref<1x8x256xf32, #tpu.memory_space<vmem>>, vector<1x8x256xf32>,
    return
  }
  func.func @transform_0(%arg0: i32) -> (i32, i32, i32) {
    %c0_i32 = arith.constant 0 : i32
    %c0_i32_0 = arith.constant 0 : i32
    %c0_i32_1 = arith.constant 0 : i32
    return %arg0, %c0_i32, %c0_i32_0 : i32, i32, i32
  }
  func.func @transform_1(%arg0: i32) -> (i32, i32) {
    %c0_i32 = arith.constant 0 : i32
    %c0_i32_0 = arith.constant 0 : i32
    %c0_i32_1 = arith.constant 0 : i32
    return %c0_i32, %c0_i32_0 : i32, i32
  }
  func.func @transform_2(%arg0: i32) -> (i32, i32) {
    %c0_i32 = arith.constant 0 : i32
    %c0_i32_0 = arith.constant 0 : i32
    %c0_i32_1 = arith.constant 0 : i32
    return %c0_i32, %c0_i32_0 : i32, i32
  }
  func.func @transform_3(%arg0: i32) -> (i32, i32) {
    %c0_i32 = arith.constant 0 : i32
    %c0_i32_0 = arith.constant 0 : i32
    %c0_i32_1 = arith.constant 0 : i32
    return %c0_i32, %c0_i32_0 : i32, i32
  }
  func.func @transform_4(%arg0: i32) -> (i32, i32) {
    %c0_i32 = arith.constant 0 : i32
    %c0_i32_0 = arith.constant 0 : i32
    %c0_i32_1 = arith.constant 0 : i32
    return %c0_i32, %c0_i32_0 : i32, i32
  }
  func.func @transform_5(%arg0: i32) -> (i32, i32) {
    %c0_i32 = arith.constant 0 : i32
    %c0_i32_0 = arith.constant 0 : i32
    %c0_i32_1 = arith.constant 0 : i32
    return %c0_i32, %c0_i32_0 : i32, i32
  }
  func.func @transform_6(%arg0: i32) -> (i32, i32, i32) {
    %c0_i32 = arith.constant 0 : i32
    %c0_i32_0 = arith.constant 0 : i32
    %c0_i32_1 = arith.constant 0 : i32
    return %arg0, %c0_i32, %c0_i32_0 : i32, i32, i32
  }
}

</mosaic_0001>

<bundles_post_ra>
// kernel: conv_block_forward.1
= control target key start
LH: loop header
LB: loop body
LE: loop exit
PB: predicated region body
PF: predicated region fallthrough
CT: control target
= control target key end

     0   :  { %s927_s21 = smov 0   ;;  %s1168_s0 = inlined_call_operand.vmem [shape: f32[2,4,256], index: 0, kind: input, shape index: {}]   ;;  %s1169_s1 = inlined_call_operand.vmem [shape: f32[9,256], index: 1, kind: input, shape index: {}]   ;;  %s1170_s2 = inlined_call_operand.vmem [shape: f32[8,36], index: 2, kind: input, shape index: {}]   ;;  %s1171_s3 = inlined_call_operand.vmem [shape: f32[8,1], index: 3, kind: input, shape index: {}]   ;;  %s1172_s4 = inlined_call_operand.vmem [shape: f32[8,72], index: 4, kind: input, shape index: {}]   ;;  %s1173_s5 = inlined_call_operand.vmem [shape: f32[8,1], index: 5, kind: input, shape index: {}]   ;;  %s1174_s6 = inlined_call_operand.vmem [shape: f32[2,8,256], index: 6, kind: output, shape index: {}]  }
   0x1 LB: > { %s829_s22 = sadd.s32 4294967295, %s880_s21   ;;  %p833_p0 = scmp.ge.s32.totalorder %s880_s21, 1  ;;  %s880_s21 = sphi %s927_s21, %s16_s21  }
   0x2   : > { %p212_p1 = scmp.lt.s32.totalorder %s880_s21, 3 }
   0x4   : > { %p213_p2 = pnand %p833_p0, %p212_p1 }
   0x5   : > { %p242_p3 = scmp.lt.s32.totalorder (!%p213_p2), %s829_s22, 1  ;;  %s882_s27 = smov (!%p213_p2), 111  }
   0x6   : > { %216 = sbr.rel (%p213_p2) target bundleno = 713 (0x2c9), region = 44  ;;  %s883_s28 = smov (!%p213_p2), 112  }
   0x7   : > { %s884_s29 = smov (!%p213_p2), 127   ;;  %s885_s30 = smov (!%p213_p2), 113  }
   0x8   : > { %s886_s7 = smov (!%p213_p2), 1   ;;  %s887_s8 = smov (!%p213_p2), 16  }
   0x9   : > { %s890_s9 = smov (!%p213_p2), 15   ;;  %s891_s10 = smov (!%p213_p2), 17  }
   0xb   : > { %s1176_s22 = smov (!%p242_p3, %s829_s22), 1  ;;  %v888_v2 = vmov 0.0   ;;  %v889_v3 = vmov 0   ;;  %v505_v4 = vld [vmem:[%s1171_s3] sm:$0xff]  ;;  %v267_v5 = vlaneseq  ;;  %vm447_vm0 = vcmask 908288  }
   0xc   : > { %s852_s23 = sshll.u32 %s1176_s22, 3  ;;  %585 = vmatprep.mubr.f32.mxu0 %v888_v2  ;;  %763 = vmatprep.mubr.f32.mxu1 %v888_v2  ;;  %v841_v7 = vld [vmem:[%s1169_s1 + $0x4] ss:$8 sm:$0x3]  ;;  %vm495_vm1 = vcmask 1043456   ;;  %vm372_vm2 = vcmask 1039360  }
   0xd   : > { %s246_s26 = scalar_lea.vmem %s1168_s0, %s852_s23  ;;  %872 = vset.pattern.permute.xlu0 %v889_v3  ;;  %v268_v6 = vshrl.u32 %v267_v5, 7  ;;  %v845_v10 = vld [vmem:[%s1169_s1 + $0x10] ss:$8 sm:$0x3]  ;;  %vm422_vm3 = vcmask 916480   ;;  %vm397_vm4 = vcmask 924672  }
   0xe   : > { %v941_v0 = vld [vmem:[%s246_s26] sm:$0xff]  ;;  %vm334_vm5 = vcmask 7168   ;;  %vm284_vm6 = vcmask 130048   ;;  %vm309_vm7 = vcmask 121856   ;;  %vm260_vm8 = vcmask 138240  }
   0xf   : > { %443 = vrot.lane.b32.xlu1 %v941_v0, %s882_s27  ;;  %418 = vrot.lane.b32.xlu0 %v941_v0, %s883_s28  ;;  %v254_v1 = vcombine.high %v941_v0, %v941_v0  ;;  %v975_v8 = vsub.s32 0, %v268_v6  ;;  %v977_v9 = vsub.s32 1, %v268_v6  ;;  %v842_v17 = vld [vmem:[%s1169_s1 + $0x5] ss:$8 sm:$0x3]  ;;  %vm511_vm9 = vcmask 293888  }
  0x10   : > { %v844_v18 = vld [vmem:[%s1169_s1 + $0x7] ss:$8 sm:$0x3]  ;;  %v843_v25 = vld [vmem:[%s1169_s1 + $0x6] ss:$8 sm:$0x3] }
  0x11   : > { %v983_v13 = vrot.slane %v841_v7, %v975_v8  ;;  %v986_v14 = vrot.slane %v841_v7, %v977_v9  ;;  %v989_v15 = vrot.slane %v845_v10, %v975_v8  ;;  %v992_v16 = vrot.slane %v845_v10, %v977_v9  ;;  %v840_v54 = vld [vmem:[%s1169_s1 + $0x3] ss:$8 sm:$0x3]  ;;  %v839_v3 = vld [vmem:[%s1169_s1 + $0x2] ss:$8 sm:$0x3] }
  0x12   : > { %v1005_v24 = vrot.slane %v842_v17, %v977_v9  ;;  %v1013_v28 = vrot.slane %v844_v18, %v975_v8  ;;  %v1016_v29 = vrot.slane %v844_v18, %v977_v9  ;;  %v1019_v30 = vrot.slane %v842_v17, %v975_v8 }
  0x13   : > { %368 = vrot.lane.b32.xlu0 %v941_v0, %s884_s29  ;;  %445 = vrot.lane.b32.xlu1 %v254_v1, %s882_s27  ;;  %v365_v21 = vcombine.low %v983_v13, %v986_v14  ;;  %v1023_v33 = vrot.slane %v843_v25, %v975_v8  ;;  %v1035_v42 = vrot.slane %v843_v25, %v977_v9  ;;  %vm695_vm10 = vcmask 588800  }
  0x14   : > { %v1048_v60 = vrot.slane %v840_v54, %v975_v8  ;;  %v1051_v61 = vrot.slane %v840_v54, %v977_v9  ;;  %v1075_v17 = vrot.slane %v839_v3, %v975_v8  ;;  %v1078_v18 = vrot.slane %v839_v3, %v977_v9 }
  0x15   : > { %v367_v34 = vmul.f32 %v365_v21, %v941_v0 }
  0x17   : > { %370 = vrot.lane.b32.xlu1 %v254_v1, %s884_s29  ;;  %420 = vrot.lane.b32.xlu0 %v254_v1, %s883_s28  ;;  %v481_v49 = vcombine.high %v367_v34, %v367_v34 }
  0x1b   : > { %395 = vrot.lane.b32.xlu1 %v254_v1, %s885_s30  ;;  %393 = vrot.lane.b32.xlu0 %v941_v0, %s885_s30 }
  0x1f   : > { %332 = vrot.lane.b32.xlu1 %v941_v0, %s886_s7  ;;  %329 = vrot.lane.b32.xlu0 %v254_v1, %s886_s7 }
  0x23   : > { %282 = vrot.lane.b32.xlu1 %v941_v0, %s887_s8  ;;  %279 = vrot.lane.b32.xlu0 %v254_v1, %s887_s8 }
  0x27   : > { %307 = vrot.lane.b32.xlu1 %v941_v0, %s890_s9  ;;  %304 = vrot.lane.b32.xlu0 %v254_v1, %s890_s9 }
  0x2b   : > { %258 = vrot.lane.b32.xlu1 %v941_v0, %s891_s10  ;;  %255 = vrot.lane.b32.xlu0 %v254_v1, %s891_s10  ;;  %v838_v1 = vld [vmem:[%s1169_s1 + $0x1] ss:$8 sm:$0x3] }
  0x2c   : > { %v1066_v10 = vrot.slane %v838_v1, %v975_v8 }
  0x2f   : > { %508 = vperm.xlu0 %872, %v505_v4  }
  0x81   : > { %v444_v11 = vpop.permute.xlu1 %443  ;;  %v419_v12 = vpop.permute.xlu0 %418 }
  0x85   : > { %v369_v19 = vpop.permute.xlu0 %368  ;;  %v446_v20 = vpop.permute.xlu1 %445 }
  0x86   : > { %v448_v22 = vsel %vm447_vm0, %v444_v11, %v446_v20  ;;  %v452_v23 = vsel %vm447_vm0, %v446_v20, %v444_v11  ;;  %v265_v11 = vld [vmem:[%s1169_s1] ss:$8 sm:$0x3] }
  0x87   : > { %v466_v26 = vmul.f32 %v989_v15, %v448_v22  ;;  %v467_v27 = vmul.f32 %v992_v16, %v452_v23  ;;  %v1083_v23 = vrot.slane %v265_v11, %v975_v8  ;;  %v1086_v25 = vrot.slane %v265_v11, %v977_v9 }
  0x89   : > { %846 = vmatprep.subr.msk.mxu0 %vm495_vm1, %v467_v27  ;;  %v371_v31 = vpop.permute.xlu1 %370  ;;  %v421_v32 = vpop.permute.xlu0 %420 }
  0x8a   : > { %v373_v35 = vsel %vm372_vm2, %v369_v19, %v371_v31  ;;  %v377_v36 = vsel %vm372_vm2, %v371_v31, %v369_v19  ;;  %v423_v37 = vsel %vm422_vm3, %v419_v12, %v421_v32  ;;  %v427_v38 = vsel %vm422_vm3, %v421_v32, %v419_v12  ;;  %847 = vmatpush1.msk.msra.mxu0 %vm495_vm1, %v466_v26 }
  0x8b   : > { %v392_v39 = vmul.f32 %v1005_v24, %v377_v36  ;;  %v441_v40 = vmul.f32 %v1013_v28, %v423_v37  ;;  %v442_v41 = vmul.f32 %v1016_v29, %v427_v38  ;;  %v391_v43 = vmul.f32 %v1019_v30, %v373_v35 }
  0x8c   : > { %v1072_v12 = vrot.slane %v838_v1, %v977_v9 }
  0x8d   : > { %v396_v44 = vpop.permute.xlu1 %395  ;;  %v394_v45 = vpop.permute.xlu0 %393  ;;  %v486_v46 = vrot.slane %v392_v39, 4  ;;  %v491_v50 = vrot.slane %v441_v40, 4  ;;  %v492_v51 = vrot.slane %v442_v41, 4  ;;  %v485_v55 = vrot.slane %v391_v43, 4 }
  0x8e   : > { %v398_v47 = vsel %vm397_vm4, %v394_v45, %v396_v44  ;;  %v402_v48 = vsel %vm397_vm4, %v396_v44, %v394_v45 }
  0x8f   : > { %v416_v52 = vmul.f32 %v1023_v33, %v398_v47  ;;  %v417_v53 = vmul.f32 %v1035_v42, %v402_v48  ;;  %v501_v0 = vsel %vm495_vm1, %v481_v49, %v486_v46  ;;  %v500_v2 = vsel %vm495_vm1, %v367_v34, %v485_v55  ;;  %v504_v49 = vld [vmem:[%s1170_s2] sm:$0xff] }
  0x91   : > { %v333_v56 = vpop.permute.xlu1 %332  ;;  %v330_v57 = vpop.permute.xlu0 %329  ;;  %v503_v58 = vsel %vm495_vm1, %v417_v53, %v492_v51  ;;  %v502_v59 = vsel %vm495_vm1, %v416_v52, %v491_v50 }
  0x92   : > { %545 = vmatprep.subr.mxu0 %v503_v58  ;;  %v335_v62 = vsel %vm334_vm5, %v333_v56, %v330_v57  ;;  %v338_v63 = vsel %vm334_vm5, %v330_v57, %v333_v56  ;;  %v689_v57 = vld [vmem:[%s1173_s5] sm:$0xff] }
  0x93   : > { %546 = vmatpush1.msra.mxu0 %v502_v59  ;;  %v352_v6 = vmul.f32 %v1048_v60, %v338_v63  ;;  %v353_v7 = vmul.f32 %v1051_v61, %v335_v62 }
  0x94   : > { %547 = vmatprep.subr.mxu0 %v501_v0 }
  0x95   : > { %v283_v4 = vpop.permute.xlu1 %282  ;;  %548 = vmatpush1.msra.mxu0 %v500_v2  ;;  %v280_v5 = vpop.permute.xlu0 %279  ;;  %v476_v26 = vrot.slane %v352_v6, 4  ;;  %v477_v27 = vrot.slane %v353_v7, 4 }
  0x96   : > { %v285_v19 = vsel %vm284_vm6, %v283_v4, %v280_v5  ;;  %v288_v20 = vsel %vm284_vm6, %v280_v5, %v283_v4 }
  0x97   : > { %v302_v34 = vmul.f32 %v1066_v10, %v288_v20  ;;  %v303_v35 = vmul.f32 %v1072_v12, %v285_v19 }
  0x99   : > { %v308_v21 = vpop.permute.xlu1 %307  ;;  %v305_v22 = vpop.permute.xlu0 %304  ;;  %v470_v43 = vrot.slane %v302_v34, 4  ;;  %v471_v44 = vrot.slane %v303_v35, 4 }
  0x9a   : > { %v310_v31 = vsel %vm309_vm7, %v308_v21, %v305_v22  ;;  %v313_v32 = vsel %vm309_vm7, %v305_v22, %v308_v21 }
  0x9b   : > { %v327_v36 = vmul.f32 %v1075_v17, %v313_v32  ;;  %v328_v37 = vmul.f32 %v1078_v18, %v310_v31 }
  0x9d   : > { %v259_v38 = vpop.permute.xlu1 %258  ;;  %v256_v8 = vpop.permute.xlu0 %255  ;;  %v499_v39 = vsel %vm495_vm1, %v328_v37, %v477_v27  ;;  %v498_v9 = vsel %vm495_vm1, %v327_v36, %v476_v26 }
  0x9e   : > { %v261_v40 = vsel %vm260_vm8, %v259_v38, %v256_v8  ;;  %v264_v41 = vsel %vm260_vm8, %v256_v8, %v259_v38  ;;  %549 = vmatprep.subr.mxu0 %v499_v39 }
  0x9f   : > { %v277_v45 = vmul.f32 %v1083_v23, %v264_v41  ;;  %v278_v46 = vmul.f32 %v1086_v25, %v261_v40  ;;  %550 = vmatpush1.msra.mxu0 %v498_v9 }
  0xa1   : > { %v497_v47 = vsel %vm495_vm1, %v278_v46, %v471_v44  ;;  %v496_v48 = vsel %vm495_vm1, %v277_v45, %v470_v43 }
  0xa2   : > { %551 = vmatprep.subr.mxu0 %v497_v47 }
  0xa3   : > { %552 = vmatpush1.msra.mxu0 %v496_v48 }
  0xa4   : > { %848 = vmatmul.mubr.msk.f32.vlgmr.msra.gmra.mxu0 %vm511_vm9, %v504_v49 }
  0xaa   : > { %v509_v50 = vpop.permute.xlu0 %508 }
 0x164   : > { %v587_v51 = vpop.f32.mrf.mxu0 }
 0x165   : > { %v588_v52 = vadd.f32 %v587_v51, %v509_v50 }
 0x166   : > { %v589_v54 = vpop.f32.mrf.mxu0 }
 0x167   : > { %v592_v53 = vmax.f32 %v588_v52, 0.0  ;;  %v590_v55 = vadd.f32 %v589_v54, %v509_v50 }
 0x169   : > { %666 = vrot.lane.b32.xlu0 %v592_v53, %s883_s28  ;;  %677 = vrot.lane.b32.xlu1 %v592_v53, %s882_s27  ;;  %v593_v56 = vmax.f32 %v590_v55, 0.0  ;;  %v642_v8 = vmul.f32 %v592_v53, %v983_v13 }
 0x16d   : > { %655 = vrot.lane.b32.xlu0 %v592_v53, %s885_s30  ;;  %632 = vrot.lane.b32.xlu1 %v592_v53, %s886_s7 }
 0x171   : > { %644 = vrot.lane.b32.xlu0 %v592_v53, %s884_s29  ;;  %679 = vrot.lane.b32.xlu1 %v593_v56, %s882_s27 }
 0x175   : > { %629 = vrot.lane.b32.xlu0 %v593_v56, %s886_s7  ;;  %668 = vrot.lane.b32.xlu1 %v593_v56, %s883_s28 }
 0x179   : > { %618 = vrot.lane.b32.xlu0 %v593_v56, %s890_s9  ;;  %657 = vrot.lane.b32.xlu1 %v593_v56, %s885_s30 }
 0x17d   : > { %607 = vrot.lane.b32.xlu0 %v593_v56, %s887_s8  ;;  %646 = vrot.lane.b32.xlu1 %v593_v56, %s884_s29  ;;  %s853_s29 = sshll.u32 %s1176_s22, 4 }
 0x181   : > { %595 = vrot.lane.b32.xlu0 %v593_v56, %s891_s10  ;;  %621 = vrot.lane.b32.xlu1 %v592_v53, %s890_s9 }
 0x185   : > { %692 = vperm.xlu0 %872, %v689_v57   ;;  %610 = vrot.lane.b32.xlu1 %v592_v53, %s887_s8  ;;  %s251_s8 = scalar_lea.vmem %s1174_s6, %s853_s29 }
 0x189   : > { %599 = vrot.lane.b32.xlu1 %v592_v53, %s891_s10 }
 0x1db   : > { %v667_v58 = vpop.permute.xlu0 %666  ;;  %v678_v59 = vpop.permute.xlu1 %677 }
 0x1df   : > { %v656_v62 = vpop.permute.xlu0 %655  ;;  %v633_v63 = vpop.permute.xlu1 %632 }
 0x1e3   : > { %v645_v0 = vpop.permute.xlu0 %644  ;;  %v680_v1 = vpop.permute.xlu1 %679 }
 0x1e4   : > { %v681_v2 = vsel %vm447_vm0, %v678_v59, %v680_v1  ;;  %v685_v3 = vsel %vm447_vm0, %v680_v1, %v678_v59 }
 0x1e5   : > { %v687_v4 = vmul.f32 %v685_v3, %v992_v16  ;;  %v686_v5 = vmul.f32 %v681_v2, %v989_v15 }
 0x1e7   : > { %713 = vmatprep.subr.mxu1 %v687_v4  ;;  %v669_v6 = vpop.permute.xlu1 %668  ;;  %v630_v19 = vpop.permute.xlu0 %629 }
 0x1e8   : > { %v670_v7 = vsel %vm422_vm3, %v667_v58, %v669_v6  ;;  %v674_v11 = vsel %vm422_vm3, %v669_v6, %v667_v58  ;;  %714 = vmatpush1.msra.mxu1 %v686_v5  ;;  %v634_v36 = vsel %vm334_vm5, %v633_v63, %v630_v19  ;;  %v637_v37 = vsel %vm334_vm5, %v630_v19, %v633_v63 }
 0x1e9   : > { %v675_v20 = vmul.f32 %v670_v7, %v1013_v28  ;;  %v676_v21 = vmul.f32 %v674_v11, %v1016_v29  ;;  %v639_v39 = vmul.f32 %v634_v36, %v1051_v61 }
 0x1eb   : > { %715 = vmatprep.subr.mxu1 %v676_v21  ;;  %v658_v22 = vpop.permute.xlu1 %657  ;;  %v619_v31 = vpop.permute.xlu0 %618 }
 0x1ec   : > { %v659_v26 = vsel %vm397_vm4, %v656_v62, %v658_v22  ;;  %v663_v16 = vsel %vm397_vm4, %v658_v22, %v656_v62  ;;  %716 = vmatpush1.msra.mxu1 %v675_v20 }
 0x1ed   : > { %v664_v15 = vmul.f32 %v659_v26, %v1023_v33  ;;  %v665_v27 = vmul.f32 %v663_v16, %v1035_v42  ;;  %v643_v42 = vmul.f32 %v593_v56, %v986_v14 }
 0x1ef   : > { %717 = vmatprep.subr.mxu1 %v665_v27  ;;  %v647_v32 = vpop.permute.xlu1 %646  ;;  %v608_v9 = vpop.permute.xlu0 %607 }
 0x1f0   : > { %v648_v34 = vsel %vm372_vm2, %v645_v0, %v647_v32  ;;  %v652_v28 = vsel %vm372_vm2, %v647_v32, %v645_v0  ;;  %718 = vmatpush1.msra.mxu1 %v664_v15 }
 0x1f1   : > { %v653_v29 = vmul.f32 %v648_v34, %v1019_v30  ;;  %v654_v35 = vmul.f32 %v652_v28, %v1005_v24  ;;  %v638_v24 = vmul.f32 %v637_v37, %v1048_v60 }
 0x1f3   : > { %719 = vmatprep.subr.mxu1 %v654_v35  ;;  %v622_v33 = vpop.permute.xlu1 %621  ;;  %v596_v60 = vpop.permute.xlu0 %595 }
 0x1f4   : > { %v623_v38 = vsel %vm309_vm7, %v622_v33, %v619_v31  ;;  %720 = vmatpush1.msra.mxu1 %v653_v29  ;;  %v626_v30 = vsel %vm309_vm7, %v619_v31, %v622_v33 }
 0x1f5   : > { %721 = vmatprep.subr.mxu1 %v643_v42  ;;  %v628_v40 = vmul.f32 %v623_v38, %v1078_v18  ;;  %v627_v14 = vmul.f32 %v626_v30, %v1075_v17 }
 0x1f6   : > { %722 = vmatpush1.msra.mxu1 %v642_v8 }
 0x1f7   : > { %v611_v41 = vpop.permute.xlu1 %610  ;;  %723 = vmatprep.subr.mxu1 %v639_v39 }
 0x1f8   : > { %v612_v43 = vsel %vm284_vm6, %v611_v41, %v608_v9  ;;  %v615_v44 = vsel %vm284_vm6, %v608_v9, %v611_v41  ;;  %724 = vmatpush1.msra.mxu1 %v638_v24 }
 0x1f9   : > { %v616_v13 = vmul.f32 %v615_v44, %v1066_v10  ;;  %v617_v61 = vmul.f32 %v612_v43, %v1072_v12  ;;  %725 = vmatprep.subr.mxu1 %v628_v40  ;;  %v688_v10 = vld [vmem:[%s1172_s4] sm:$0xff] }
 0x1fa   : > { %726 = vmatpush1.msra.mxu1 %v627_v14 }
 0x1fb   : > { %v600_v45 = vpop.permute.xlu1 %599  ;;  %727 = vmatprep.subr.mxu1 %v617_v61 }
 0x1fc   : > { %v601_v18 = vsel %vm260_vm8, %v600_v45, %v596_v60  ;;  %v604_v46 = vsel %vm260_vm8, %v596_v60, %v600_v45  ;;  %728 = vmatpush1.msra.mxu1 %v616_v13 }
 0x1fd   : > { %v605_v17 = vmul.f32 %v604_v46, %v1083_v23  ;;  %v606_v47 = vmul.f32 %v601_v18, %v1086_v25 }
 0x1ff   : > { %729 = vmatprep.subr.mxu1 %v606_v47 }
 0x200   : > { %730 = vmatpush1.msra.mxu1 %v605_v17  ;;  %v693_v12 = vpop.permute.xlu0 %692 }
 0x201   : > { %849 = vmatmul.mubr.msk.f32.vlgmr.msra.gmra.mxu1 %vm695_vm10, %v688_v10 }
 0x2c1   : > { %v765_v48 = vpop.f32.mrf.mxu1 }
 0x2c2   : > { %v766_v49 = vadd.f32 %v765_v48, %v693_v12 }
 0x2c3   : > { %v767_v50 = vpop.f32.mrf.mxu1 }
 0x2c4   : > { %v770_v23 = vmax.f32 %v766_v49, 0.0  ;;  %v768_v51 = vadd.f32 %v767_v50, %v693_v12 }
 0x2c6   : > { %772 = vst [vmem:[%s251_s8] sm:$0xff] %v770_v23  ;;  %v771_v25 = vmax.f32 %v768_v51, 0.0 }
 0x2c8   : > { %773 = vst [vmem:[%s251_s8 + $0x8] sm:$0xff] %v771_v25 }
 0x2c9 PF: > { %s16_s21 = sadd.s32 1, %s880_s21  }
 0x2ca   : > { %p13_p4 = scmp.ge.s32.totalorder %s16_s21, 4  }
 0x2cc   :  { %15 = sbr.rel (!%p13_p4) target bundleno = 1 (0x1), region = 82 }

</bundles_post_ra>
